<compile_context>
chip_gen: v7x
topology: tpu7x:2x2x1
jax: 0.10.0
libtpu: 0.0.40
codegen_flags: <defaults>
</compile_context>

<pallas_src>
import jax
import jax.numpy as jnp
from jax.experimental import pallas as pl
from jax.experimental.pallas import tpu as pltpu

LEAKY_SLOPE = 0.2
BN_EPS = 1e-5


def _pick_l_tile(L):
    """Whole-L tiles for short sequences, else the largest 128-multiple divisor <= 512."""
    if L <= 2048:
        return L
    for tl in (512, 384, 256, 128):
        if L % tl == 0:
            return tl
    return L  # TODO(synk): ragged (masked) edge L-tiles when L has no 128-multiple divisor.


def _conv_stats_kernel(x_ref, xh_ref, w1_ref, b1_ref, w2_ref, b2_ref,
                       y_ref, stats_ref):
    """conv1(k=1)+LeakyReLU -> conv2(k=3, pad=1)+bias for one (sample, L-tile).

    Emits the *unnormalized* conv2 output as a lane-dense (Cout, TL) bf16 slab and
    per-tile per-channel [sum, sum-of-squares] partials for the global BatchNorm.
    """
    TL = x_ref.shape[1]
    t = pl.program_id(1)
    nt = pl.num_programs(1)

    # ---- conv1 (k=1): pointwise matmul, bf16 operands, f32 accumulation. ----
    x = x_ref[0].astype(jnp.bfloat16)                                   # (TL, Cin)
    h = jnp.dot(x, w1_ref[...], preferred_element_type=jnp.float32)     # (TL, mid) f32
    h = h + b1_ref[...]
    h = jnp.maximum(h, LEAKY_SLOPE * h)                                  # LeakyReLU(0.2)
    hT = h.T                                                             # (mid, TL) f32

    # Halo columns of h (the neighbouring tiles' boundary columns), recomputed from
    # the two halo columns of x.  They must be exactly zero at the true sequence
    # ends: conv2 zero-pads h itself, not LeakyReLU(conv1(0)).
    xh = xh_ref[0, 0].astype(jnp.bfloat16)                               # (2, Cin)
    hh = jnp.dot(xh, w1_ref[...], preferred_element_type=jnp.float32) + b1_ref[...]
    hhT = jnp.maximum(hh, LEAKY_SLOPE * hh).T                            # (mid, 2) f32
    zcol = jnp.zeros((hhT.shape[0], 1), jnp.float32)
    left = jnp.where(t > 0, hhT[:, 0:1], zcol)                           # h[:, tile_start-1]
    right = jnp.where(t < nt - 1, hhT[:, 1:2], zcol)                     # h[:, tile_end]

    # Shifted copies of h along the lane (L) axis for the three conv taps.
    h_prev = jnp.concatenate([left, hT[:, :TL - 1]], axis=1).astype(jnp.bfloat16)
    h_mid = hT.astype(jnp.bfloat16)
    h_next = jnp.concatenate([hT[:, 1:], right], axis=1).astype(jnp.bfloat16)

    # ---- conv2 (k=3, pad=1): three shifted-accumulate bf16 matmuls, output
    #      already in (Cout, TL) layout (lane-dense stores, no big transpose). ----
    acc = jnp.dot(w2_ref[0], h_prev, preferred_element_type=jnp.float32)
    acc = acc + jnp.dot(w2_ref[1], h_mid, preferred_element_type=jnp.float32)
    acc = acc + jnp.dot(w2_ref[2], h_next, preferred_element_type=jnp.float32)
    acc = acc + b2_ref[...]                                              # (Cout, TL) f32

    # Per-tile BatchNorm partials from the f32 accumulator (before the bf16 cast).
    s = jnp.sum(acc, axis=1, keepdims=True)                              # (Cout, 1)
    ss = jnp.sum(acc * acc, axis=1, keepdims=True)                       # (Cout, 1)
    stats_ref[0, 0] = jnp.concatenate([s, ss], axis=1)                   # (Cout, 2)

    y_ref[0] = acc.astype(y_ref.dtype)                                   # bf16 (Cout, TL)


def _bn_apply_kernel(y_ref, scale_ref, shift_ref, o_ref):
    """Apply the precomputed global BN scale/shift per row of the (N*Cout, L) view."""
    o_ref[...] = y_ref[...].astype(jnp.float32) * scale_ref[...] + shift_ref[...]


def feature_extractor_forward(x, w1, b1, w2, b2, gamma, beta):
    """x: (N, L, Cin) channels-last input. Returns (N, Cout, L) like the PyTorch module."""
    N, L, Cin = x.shape
    mid = w1.shape[0]
    Cout = w2.shape[0]

    TL = _pick_l_tile(L)
    nt = L // TL

    # Parameter re-layout (tiny plain-JAX glue): PyTorch conv layout -> matmul layout.
    w1_k = jnp.transpose(w1[:, :, 0], (1, 0)).astype(jnp.bfloat16)       # (Cin, mid)
    b1_k = b1.reshape(1, mid).astype(jnp.float32)
    w2_k = jnp.transpose(w2, (2, 0, 1)).astype(jnp.bfloat16)             # (3, Cout, mid) tap-major
    b2_k = b2.reshape(Cout, 1).astype(jnp.float32)

    # Halo columns of x per L-tile: x[:, t*TL-1, :] and x[:, (t+1)*TL, :] (zeros at
    # the sequence ends).  Only 2*(nt-1) columns are gathered -- no full copy of x.
    zcol = jnp.zeros((N, 1, Cin), x.dtype)
    left_cols = jnp.concatenate([zcol, x[:, TL - 1:L - 1:TL, :]], axis=1)   # (N, nt, Cin)
    right_cols = jnp.concatenate([x[:, TL:L:TL, :], zcol], axis=1)          # (N, nt, Cin)
    x_halo = jnp.stack([left_cols, right_cols], axis=2)                     # (N, nt, 2, Cin)

    flops = 2 * N * L * (Cin * mid + 3 * mid * Cout)
    bytes_accessed = (N * L * Cin * x.dtype.itemsize       # x in
                      + N * Cout * L * 2                   # bf16 y out
                      + N * nt * Cout * 2 * 4              # stats out
                      + int(w1_k.size) * 2 + int(w2_k.size) * 2)

    # --- Pass 1: conv1 + LeakyReLU + conv2 (+bias) per (sample, L-tile). ---
    y_unnorm, stats = pl.pallas_call(
        _conv_stats_kernel,
        out_shape=(jax.ShapeDtypeStruct((N, Cout, L), jnp.bfloat16),
                   jax.ShapeDtypeStruct((N, nt, Cout, 2), jnp.float32)),
        grid=(N, nt),
        in_specs=[
            pl.BlockSpec((1, TL, Cin), lambda n, t: (n, t, 0)),
            pl.BlockSpec((1, 1, 2, Cin), lambda n, t: (n, t, 0, 0)),
            pl.BlockSpec((Cin, mid), lambda n, t: (0, 0)),
            pl.BlockSpec((1, mid), lambda n, t: (0, 0)),
            pl.BlockSpec((3, Cout, mid), lambda n, t: (0, 0, 0)),
            pl.BlockSpec((Cout, 1), lambda n, t: (0, 0)),
        ],
        out_specs=(
            pl.BlockSpec((1, Cout, TL), lambda n, t: (n, 0, t)),
            pl.BlockSpec((1, 1, Cout, 2), lambda n, t: (n, t, 0, 0)),
        ),
        compiler_params=pltpu.CompilerParams(
            dimension_semantics=("parallel", "parallel")),
        cost_estimate=pl.CostEstimate(flops=flops, transcendentals=0,
                                      bytes_accessed=bytes_accessed),
    )(x, x_halo, w1_k, b1_k, w2_k, b2_k)

    # --- Finalize global (training-mode, biased) BN statistics: O(Cout) work. ---
    # TODO(synk): one-pass E[x^2]-E[x]^2 in f32 can cancel for large-mean channels;
    # switch to a two-pass mean/var if that regime matters.
    totals = jnp.sum(stats, axis=(0, 1))                                 # (Cout, 2)
    count = jnp.float32(N * L)
    mean = totals[:, 0] / count
    var = jnp.maximum(totals[:, 1] / count - mean * mean, 0.0)
    inv = jax.lax.rsqrt(var + BN_EPS) * gamma.astype(jnp.float32)        # (Cout,)
    shift = beta.astype(jnp.float32) - mean * inv                        # (Cout,)

    # --- Pass 2: bandwidth-only normalize on the (N*Cout, L) 2-D view with large
    #     lane-dense row tiles (reads bf16 y, writes f32 output). ---
    R = N * Cout
    target_rows = max(8, (1 << 19) // max(L, 1) // 8 * 8)                # ~0.5M elems per tile
    TR = R if R <= target_rows else target_rows
    scale_rows = jnp.tile(inv.reshape(1, Cout), (N, 1)).reshape(R, 1)
    shift_rows = jnp.tile(shift.reshape(1, Cout), (N, 1)).reshape(R, 1)

    out2 = pl.pallas_call(
        _bn_apply_kernel,
        out_shape=jax.ShapeDtypeStruct((R, L), jnp.float32),
        grid=(pl.cdiv(R, TR),),
        in_specs=[
            pl.BlockSpec((TR, L), lambda r: (r, 0)),
            pl.BlockSpec((TR, 1), lambda r: (r, 0)),
            pl.BlockSpec((TR, 1), lambda r: (r, 0)),
        ],
        out_specs=pl.BlockSpec((TR, L), lambda r: (r, 0)),
        compiler_params=pltpu.CompilerParams(
            dimension_semantics=("parallel",)),
    )(y_unnorm.reshape(R, L), scale_rows, shift_rows)

    return out2.reshape(N, Cout, L)


def _reference(x, w1, b1, w2, b2, gamma, beta):
    """Pure-JAX reference mirroring the PyTorch forward (training-mode BatchNorm)."""
    N, L, Cin = x.shape
    xt = jnp.transpose(x, (0, 2, 1))                                     # (N, Cin, L)
    h = jnp.einsum('ncl,mc->nml', xt, w1[:, :, 0]) + b1[None, :, None]
    h = jnp.where(h >= 0, h, LEAKY_SLOPE * h)
    hp = jnp.pad(h, ((0, 0), (0, 0), (1, 1)))
    y = jnp.zeros((N, w2.shape[0], L), jnp.float32)
    for k in range(3):
        y = y + jnp.einsum('nml,om->nol', hp[:, :, k:k + L], w2[:, :, k])
    y = y + b2[None, :, None]
    mean = y.mean(axis=(0, 2), keepdims=True)
    var = ((y - mean) ** 2).mean(axis=(0, 2), keepdims=True)
    return (y - mean) / jnp.sqrt(var + BN_EPS) * gamma[None, :, None] + beta[None, :, None]


if __name__ == "__main__":
    # Small shapes consistent with the module: in_channels divisible by 16.
    N, L, Cin, Cout = 2, 16, 64, 16
    mid = Cin // 16

    key = jax.random.PRNGKey(0)
    kx, k1, k2, k3, k4 = jax.random.split(key, 5)

    x = jax.random.normal(kx, (N, L, Cin), jnp.float32)
    # Deterministic synthetic parameters (PyTorch conv layout: (out, in, kernel)).
    w1 = 0.1 * jax.random.normal(k1, (mid, Cin, 1), jnp.float32)
    b1 = 0.1 * jax.random.normal(k2, (mid,), jnp.float32)
    w2 = 0.1 * jax.random.normal(k3, (Cout, mid, 3), jnp.float32)
    b2 = 0.1 * jax.random.normal(k4, (Cout,), jnp.float32)
    gamma = jnp.ones((Cout,), jnp.float32)   # BatchNorm1d default affine init
    beta = jnp.zeros((Cout,), jnp.float32)

    fwd = jax.jit(feature_extractor_forward)
    out = fwd(x, w1, b1, w2, b2, gamma, beta)
    out = jax.block_until_ready(out)

    ref = _reference(x, w1, b1, w2, b2, gamma, beta)
    assert out.shape == (N, Cout, L), out.shape
    err = float(jnp.max(jnp.abs(out - ref)))
    # bf16 MXU operands + bf16 intermediate y => loosened tolerance vs the f32 reference.
    assert err < 1e-1, err

    print("KERNEL_OK")
</pallas_src>

<mosaic_0001>
module attributes {stable_mosaic.version = 11 : i64} {
  func.func @_conv_stats_kernel(%arg0: i32, %arg1: i32, %arg2: memref<1x16x64xf32, #tpu.memory_space<vmem>>, %arg3: memref<1x1x2x64xf32, #tpu.memory_space<vmem>>, %arg4: memref<64x4xbf16, #tpu.memory_space<vmem>>, %arg5: memref<1x4xf32, #tpu.memory_space<vmem>>, %arg6: memref<3x16x4xbf16, #tpu.memory_space<vmem>>, %arg7: memref<16x1xf32, #tpu.memory_space<vmem>>, %arg8: memref<1x16x16xbf16, #tpu.memory_space<vmem>>, %arg9: memref<1x1x16x2xf32, #tpu.memory_space<vmem>>) attributes {dimension_semantics = [#tpu.dimension_semantics<parallel>, #tpu.dimension_semantics<parallel>], iteration_bounds = array<i64: 2, 1>, scalar_prefetch = 0 : i64, scratch_operands = 0 : i64, tpu.core_type = #tpu.core_type<tc>, window_params = [{transform_indices = @transform_0, window_bounds = array<i64: 1, 16, 64>}, {transform_indices = @transform_1, window_bounds = array<i64: 1, 1, 2, 64>}, {pipeline_mode = #tpu.pipeline_mode<synchronous>, transform_indices = @transform_2, window_bounds = array<i64: 64, 4>}, {pipeline_mode = #tpu.pipeline_mode<synchronous>, transform_indices = @transform_3, window_bounds = array<i64: 1, 4>}, {pipeline_mode = #tpu.pipeline_mode<synchronous>, transform_indices = @transform_4, window_bounds = array<i64: 3, 16, 4>}, {pipeline_mode = #tpu.pipeline_mode<synchronous>, transform_indices = @transform_5, window_bounds = array<i64: 16, 1>}, {transform_indices = @transform_6, window_bounds = array<i64: 1, 16, 16>}, {transform_indices = @transform_7, window_bounds = array<i64: 1, 1, 16, 2>}]} {
    %c0 = arith.constant 0 : index
    %c0_0 = arith.constant 0 : index
    %c0_1 = arith.constant 0 : index
    %0 = vector.load %arg2[%c0, %c0_0, %c0_1] : memref<1x16x64xf32, #tpu.memory_space<vmem>>, vector<1x16x64xf32>
    %1 = vector.shape_cast %0 : vector<1x16x64xf32> to vector<16x64xf32>
    %2 = arith.truncf %1 : vector<16x64xf32> to vector<16x64xbf16>
    %c0_2 = arith.constant 0 : index
    %c0_3 = arith.constant 0 : index
    %3 = vector.load %arg4[%c0_2, %c0_3] : memref<64x4xbf16, #tpu.memory_space<vmem>>, vector<64x4xbf16>
    %cst = arith.constant dense<0.000000e+00> : vector<16x4xf32>
    %4 = tpu.matmul %2, %3, %cst {dimension_numbers = #tpu.dot_dimension_numbers<[1], [0], [0], [1], [0, 0, 1, 1], [], []>} : vector<16x64xbf16>, vector<64x4xbf16>, vector<16x4xf32> -> vector<16x4xf32>
    %c0_4 = arith.constant 0 : index
    %c0_5 = arith.constant 0 : index
    %5 = vector.load %arg5[%c0_4, %c0_5] : memref<1x4xf32, #tpu.memory_space<vmem>>, vector<1x4xf32>
    %6 = vector.broadcast %5 : vector<1x4xf32> to vector<16x4xf32>
    %7 = arith.addf %4, %6 : vector<16x4xf32>
    %cst_6 = arith.constant 2.000000e-01 : f32
    %8 = vector.broadcast %cst_6 : f32 to vector<16x4xf32>
    %9 = arith.mulf %8, %7 : vector<16x4xf32>
    %10 = arith.maximumf %7, %9 : vector<16x4xf32>
    %11 = tpu.transpose %10, [1, 0] : vector<16x4xf32> -> vector<4x16xf32>
    %c0_7 = arith.constant 0 : index
    %c0_8 = arith.constant 0 : index
    %c0_9 = arith.constant 0 : index
    %c0_10 = arith.constant 0 : index
    %12 = vector.load %arg3[%c0_7, %c0_8, %c0_9, %c0_10] : memref<1x1x2x64xf32, #tpu.memory_space<vmem>>, vector<1x1x2x64xf32>
    %13 = vector.shape_cast %12 : vector<1x1x2x64xf32> to vector<2x64xf32>
    %14 = arith.truncf %13 : vector<2x64xf32> to vector<2x64xbf16>
    %c0_11 = arith.constant 0 : index
    %c0_12 = arith.constant 0 : index
    %15 = vector.load %arg4[%c0_11, %c0_12] : memref<64x4xbf16, #tpu.memory_space<vmem>>, vector<64x4xbf16>
    %cst_13 = arith.constant dense<0.000000e+00> : vector<2x4xf32>
    %16 = tpu.matmul %14, %15, %cst_13 {dimension_numbers = #tpu.dot_dimension_numbers<[1], [0], [0], [1], [0, 0, 1, 1], [], []>} : vector<2x64xbf16>, vector<64x4xbf16>, vector<2x4xf32> -> vector<2x4xf32>
    %c0_14 = arith.constant 0 : index
    %c0_15 = arith.constant 0 : index
    %17 = vector.load %arg5[%c0_14, %c0_15] : memref<1x4xf32, #tpu.memory_space<vmem>>, vector<1x4xf32>
    %18 = vector.broadcast %17 : vector<1x4xf32> to vector<2x4xf32>
    %19 = arith.addf %16, %18 : vector<2x4xf32>
    %cst_16 = arith.constant 2.000000e-01 : f32
    %20 = vector.broadcast %cst_16 : f32 to vector<2x4xf32>
    %21 = arith.mulf %20, %19 : vector<2x4xf32>
    %22 = arith.maximumf %19, %21 : vector<2x4xf32>
    %23 = tpu.transpose %22, [1, 0] : vector<2x4xf32> -> vector<4x2xf32>
    %cst_17 = arith.constant 0.000000e+00 : f32
    %24 = vector.broadcast %cst_17 : f32 to vector<4x1xf32>
    %c0_i32 = arith.constant 0 : i32
    %25 = arith.cmpi sgt, %arg1, %c0_i32 : i32
    %26 = vector.extract_strided_slice %23 {offsets = [0, 0], sizes = [4, 1], strides = [1, 1]} : vector<4x2xf32> to vector<4x1xf32>
    %27 = arith.select %25, %26, %24 : vector<4x1xf32>
    %c0_i32_18 = arith.constant 0 : i32
    %28 = arith.cmpi slt, %arg1, %c0_i32_18 : i32
    %29 = vector.extract_strided_slice %23 {offsets = [0, 1], sizes = [4, 1], strides = [1, 1]} : vector<4x2xf32> to vector<4x1xf32>
    %30 = arith.select %28, %29, %24 : vector<4x1xf32>
    %31 = vector.extract_strided_slice %11 {offsets = [0, 0], sizes = [4, 15], strides = [1, 1]} : vector<4x16xf32> to vector<4x15xf32>
    %32 = tpu.concatenate %27, %31 in 1 : vector<4x1xf32>, vector<4x15xf32> -> vector<4x16xf32>
    %33 = arith.truncf %32 : vector<4x16xf32> to vector<4x16xbf16>
    %34 = arith.truncf %11 : vector<4x16xf32> to vector<4x16xbf16>
    %35 = vector.extract_strided_slice %11 {offsets = [0, 1], sizes = [4, 15], strides = [1, 1]} : vector<4x16xf32> to vector<4x15xf32>
    %36 = tpu.concatenate %35, %30 in 1 : vector<4x15xf32>, vector<4x1xf32> -> vector<4x16xf32>
    %37 = arith.truncf %36 : vector<4x16xf32> to vector<4x16xbf16>
    %c0_19 = arith.constant 0 : index
    %c0_20 = arith.constant 0 : index
    %c0_21 = arith.constant 0 : index
    %38 = vector.load %arg6[%c0_19, %c0_20, %c0_21] : memref<3x16x4xbf16, #tpu.memory_space<vmem>>, vector<1x16x4xbf16>
    %39 = vector.shape_cast %38 : vector<1x16x4xbf16> to vector<16x4xbf16>
    %cst_22 = arith.constant dense<0.000000e+00> : vector<16x16xf32>
    %40 = tpu.matmul %39, %33, %cst_22 {dimension_numbers = #tpu.dot_dimension_numbers<[1], [0], [0], [1], [0, 0, 1, 1], [], []>} : vector<16x4xbf16>, vector<4x16xbf16>, vector<16x16xf32> -> vector<16x16xf32>
    %c1 = arith.constant 1 : index
    %c0_23 = arith.constant 0 : index
    %c0_24 = arith.constant 0 : index
    %41 = vector.load %arg6[%c1, %c0_23, %c0_24] : memref<3x16x4xbf16, #tpu.memory_space<vmem>>, vector<1x16x4xbf16>
    %42 = vector.shape_cast %41 : vector<1x16x4xbf16> to vector<16x4xbf16>
    %cst_25 = arith.constant dense<0.000000e+00> : vector<16x16xf32>
    %43 = tpu.matmul %42, %34, %cst_25 {dimension_numbers = #tpu.dot_dimension_numbers<[1], [0], [0], [1], [0, 0, 1, 1], [], []>} : vector<16x4xbf16>, vector<4x16xbf16>, vector<16x16xf32> -> vector<16x16xf32>
    %44 = arith.addf %40, %43 : vector<16x16xf32>
    %c2 = arith.constant 2 : index
    %c0_26 = arith.constant 0 : index
    %c0_27 = arith.constant 0 : index
    %45 = vector.load %arg6[%c2, %c0_26, %c0_27] : memref<3x16x4xbf16, #tpu.memory_space<vmem>>, vector<1x16x4xbf16>
    %46 = vector.shape_cast %45 : vector<1x16x4xbf16> to vector<16x4xbf16>
    %cst_28 = arith.constant dense<0.000000e+00> : vector<16x16xf32>
    %47 = tpu.matmul %46, %37, %cst_28 {dimension_numbers = #tpu.dot_dimension_numbers<[1], [0], [0], [1], [0, 0, 1, 1], [], []>} : vector<16x4xbf16>, vector<4x16xbf16>, vector<16x16xf32> -> vector<16x16xf32>
    %48 = arith.addf %44, %47 : vector<16x16xf32>
    %c0_29 = arith.constant 0 : index
    %c0_30 = arith.constant 0 : index
    %49 = vector.load %arg7[%c0_29, %c0_30] : memref<16x1xf32, #tpu.memory_space<vmem>>, vector<16x1xf32>
    %50 = vector.broadcast %49 : vector<16x1xf32> to vector<16x16xf32>
    %51 = arith.addf %48, %50 : vector<16x16xf32>
    %cst_31 = arith.constant dense<0.000000e+00> : vector<16xf32>
    %52 = vector.multi_reduction <add>, %51, %cst_31 [1] : vector<16x16xf32> to vector<16xf32>
    %53 = vector.shape_cast %52 : vector<16xf32> to vector<16x1xf32>
    %54 = arith.mulf %51, %51 : vector<16x16xf32>
    %cst_32 = arith.constant dense<0.000000e+00> : vector<16xf32>
    %55 = vector.multi_reduction <add>, %54, %cst_32 [1] : vector<16x16xf32> to vector<16xf32>
    %56 = vector.shape_cast %55 : vector<16xf32> to vector<16x1xf32>
    %57 = tpu.concatenate %53, %56 in 1 : vector<16x1xf32>, vector<16x1xf32> -> vector<16x2xf32>
    %c0_33 = arith.constant 0 : index
    %c0_34 = arith.constant 0 : index
    %c0_35 = arith.constant 0 : index
    %c0_36 = arith.constant 0 : index
    %58 = vector.load %arg9[%c0_33, %c0_34, %c0_35, %c0_36] : memref<1x1x16x2xf32, #tpu.memory_space<vmem>>, vector<1x1x16x2xf32>
    %59 = vector.shape_cast %58 : vector<1x1x16x2xf32> to vector<16x2xf32>
    %60 = vector.shape_cast %57 : vector<16x2xf32> to vector<1x1x16x2xf32>
    tpu.vector_store %arg9[%c0_33, %c0_34, %c0_35, %c0_36], %60 {strides = array<i32>} : memref<1x1x16x2xf32, #tpu.memory_space<vmem>>, vector<1x1x16x2xf32>,
    %61 = arith.truncf %51 : vector<16x16xf32> to vector<16x16xbf16>
    %c0_37 = arith.constant 0 : index
    %c0_38 = arith.constant 0 : index
    %c0_39 = arith.constant 0 : index
    %62 = vector.load %arg8[%c0_37, %c0_38, %c0_39] : memref<1x16x16xbf16, #tpu.memory_space<vmem>>, vector<1x16x16xbf16>
    %63 = vector.shape_cast %62 : vector<1x16x16xbf16> to vector<16x16xbf16>
    %64 = vector.shape_cast %61 : vector<16x16xbf16> to vector<1x16x16xbf16>
    tpu.vector_store %arg8[%c0_37, %c0_38, %c0_39], %64 {strides = array<i32>} : memref<1x16x16xbf16, #tpu.memory_space<vmem>>, vector<1x16x16xbf16>,
    return
  }
  func.func @transform_0(%arg0: i32, %arg1: i32) -> (i32, i32, i32) {
    %c0_i32 = arith.constant 0 : i32
    %c0_i32_0 = arith.constant 0 : i32
    return %arg0, %arg1, %c0_i32 : i32, i32, i32
  }
  func.func @transform_1(%arg0: i32, %arg1: i32) -> (i32, i32, i32, i32) {
    %c0_i32 = arith.constant 0 : i32
    %c0_i32_0 = arith.constant 0 : i32
    %c0_i32_1 = arith.constant 0 : i32
    return %arg0, %arg1, %c0_i32, %c0_i32_0 : i32, i32, i32, i32
  }
  func.func @transform_2(%arg0: i32, %arg1: i32) -> (i32, i32) {
    %c0_i32 = arith.constant 0 : i32
    %c0_i32_0 = arith.constant 0 : i32
    %c0_i32_1 = arith.constant 0 : i32
    return %c0_i32, %c0_i32_0 : i32, i32
  }
  func.func @transform_3(%arg0: i32, %arg1: i32) -> (i32, i32) {
    %c0_i32 = arith.constant 0 : i32
    %c0_i32_0 = arith.constant 0 : i32
    %c0_i32_1 = arith.constant 0 : i32
    return %c0_i32, %c0_i32_0 : i32, i32
  }
  func.func @transform_4(%arg0: i32, %arg1: i32) -> (i32, i32, i32) {
    %c0_i32 = arith.constant 0 : i32
    %c0_i32_0 = arith.constant 0 : i32
    %c0_i32_1 = arith.constant 0 : i32
    %c0_i32_2 = arith.constant 0 : i32
    return %c0_i32, %c0_i32_0, %c0_i32_1 : i32, i32, i32
  }
  func.func @transform_5(%arg0: i32, %arg1: i32) -> (i32, i32) {
    %c0_i32 = arith.constant 0 : i32
    %c0_i32_0 = arith.constant 0 : i32
    %c0_i32_1 = arith.constant 0 : i32
    return %c0_i32, %c0_i32_0 : i32, i32
  }
  func.func @transform_6(%arg0: i32, %arg1: i32) -> (i32, i32, i32) {
    %c0_i32 = arith.constant 0 : i32
    %c0_i32_0 = arith.constant 0 : i32
    return %arg0, %c0_i32, %arg1 : i32, i32, i32
  }
  func.func @transform_7(%arg0: i32, %arg1: i32) -> (i32, i32, i32, i32) {
    %c0_i32 = arith.constant 0 : i32
    %c0_i32_0 = arith.constant 0 : i32
    %c0_i32_1 = arith.constant 0 : i32
    return %arg0, %arg1, %c0_i32, %c0_i32_0 : i32, i32, i32, i32
  }
}

module attributes {stable_mosaic.version = 11 : i64} {
  func.func @_bn_apply_kernel(%arg0: i32, %arg1: memref<32x16xbf16, #tpu.memory_space<vmem>>, %arg2: memref<32x1xf32, #tpu.memory_space<vmem>>, %arg3: memref<32x1xf32, #tpu.memory_space<vmem>>, %arg4: memref<32x16xf32, #tpu.memory_space<vmem>>) attributes {dimension_semantics = [#tpu.dimension_semantics<parallel>], iteration_bounds = array<i64: 1>, scalar_prefetch = 0 : i64, scratch_operands = 0 : i64, tpu.core_type = #tpu.core_type<tc>, window_params = [{transform_indices = @transform_0, window_bounds = array<i64: 32, 16>}, {transform_indices = @transform_1, window_bounds = array<i64: 32, 1>}, {transform_indices = @transform_2, window_bounds = array<i64: 32, 1>}, {transform_indices = @transform_3, window_bounds = array<i64: 32, 16>}]} {
    %c0 = arith.constant 0 : index
    %c0_0 = arith.constant 0 : index
    %0 = vector.load %arg1[%c0, %c0_0] : memref<32x16xbf16, #tpu.memory_space<vmem>>, vector<32x16xbf16>
    %1 = arith.extf %0 : vector<32x16xbf16> to vector<32x16xf32>
    %c0_1 = arith.constant 0 : index
    %c0_2 = arith.constant 0 : index
    %2 = vector.load %arg2[%c0_1, %c0_2] : memref<32x1xf32, #tpu.memory_space<vmem>>, vector<32x1xf32>
    %3 = vector.broadcast %2 : vector<32x1xf32> to vector<32x16xf32>
    %4 = arith.mulf %1, %3 : vector<32x16xf32>
    %c0_3 = arith.constant 0 : index
    %c0_4 = arith.constant 0 : index
    %5 = vector.load %arg3[%c0_3, %c0_4] : memref<32x1xf32, #tpu.memory_space<vmem>>, vector<32x1xf32>
    %6 = vector.broadcast %5 : vector<32x1xf32> to vector<32x16xf32>
    %7 = arith.addf %4, %6 : vector<32x16xf32>
    %c0_5 = arith.constant 0 : index
    %c0_6 = arith.constant 0 : index
    %8 = vector.load %arg4[%c0_5, %c0_6] : memref<32x16xf32, #tpu.memory_space<vmem>>, vector<32x16xf32>
    tpu.vector_store %arg4[%c0_5, %c0_6], %7 {strides = array<i32>} : memref<32x16xf32, #tpu.memory_space<vmem>>, vector<32x16xf32>,
    return
  }
  func.func @transform_0(%arg0: i32) -> (i32, i32) {
    %c0_i32 = arith.constant 0 : i32
    %c0_i32_0 = arith.constant 0 : i32
    return %arg0, %c0_i32 : i32, i32
  }
  func.func @transform_1(%arg0: i32) -> (i32, i32) {
    %c0_i32 = arith.constant 0 : i32
    %c0_i32_0 = arith.constant 0 : i32
    return %arg0, %c0_i32 : i32, i32
  }
  func.func @transform_2(%arg0: i32) -> (i32, i32) {
    %c0_i32 = arith.constant 0 : i32
    %c0_i32_0 = arith.constant 0 : i32
    return %arg0, %c0_i32 : i32, i32
  }
  func.func @transform_3(%arg0: i32) -> (i32, i32) {
    %c0_i32 = arith.constant 0 : i32
    %c0_i32_0 = arith.constant 0 : i32
    return %arg0, %c0_i32 : i32, i32
  }
}

</mosaic_0001>

<bundles_post_ra>
// kernel: tile.14
= control target key start
LH: loop header
LB: loop body
LE: loop exit
PB: predicated region body
PF: predicated region fallthrough
CT: control target
= control target key end

     0   :  { %s22_s0 = inlined_call_operand.vmem [shape: f32[16], index: 0, kind: input, shape index: {}]   ;;  %s23_s1 = inlined_call_operand.vmem [shape: f32[2,1,1,16], index: 1, kind: output, shape index: {}]  }
   0x1   :  { %v4_v0 = vld [vmem:[%s22_s0] ss:$0 sm:$0xff] }
   0x2   :  { %5 = vst [vmem:[%s23_s1] sm:$0x3] %v4_v0 }

// kernel: tile.0
= control target key start
LH: loop header
LB: loop body
LE: loop exit
PB: predicated region body
PF: predicated region fallthrough
CT: control target
= control target key end

     0   :  { %s130_s8 = smov 125   ;;  %s131_s9 = smov 126   ;;  %vm7_vm0 = vcmask 7168   ;;  %s221_s0 = inlined_call_operand.vmem [shape: f32[2,1,1,16], index: 0, kind: input, shape index: {}]   ;;  %s222_s1 = inlined_call_operand.vmem [shape: f32[32,1], index: 1, kind: output, shape index: {}]  }
   0x1   :  { %v4_v0 = vld [vmem:[%s221_s0] sm:$0x3]  ;;  %s129_s0 = smov 127   ;;  %s132_s10 = smov 124  }
   0x2   :  { %5 = vst [vmem:[#allocation0] sm:$0x3] %v4_v0  ;;  %s133_s11 = smov 123   ;;  %s134_s12 = smov 122  }
   0x3   :  { %s135_s13 = smov 121   ;;  %s136_s14 = smov 120  }
   0x4   :  { %s137_s17 = smov 119   ;;  %s138_s18 = smov 118  }
   0x5   :  { %s139_s19 = smov 117   ;;  %s140_s20 = smov 116  }
   0x6   :  { %s141_s21 = smov 115   ;;  %s142_s22 = smov 114  }
   0x7   :  { %s143_s23 = smov 113  }
   0x9   :  { %v9_v1 = vld [vmem:[#allocation0] sm:$0x3]  }
   0xa   :  { %v21_v2 = vld [vmem:[#allocation0] sm:$0x3]   ;;  %10 = vrot.lane.b32.xlu0 %v9_v1, %s129_s0 }
   0xb   :  { %22 = vrot.lane.b32.xlu1 %v21_v2, %s130_s8  ;;  %v15_v3 = vld [vmem:[#allocation0] sm:$0x3]  }
   0xc   :  { %v27_v4 = vld [vmem:[#allocation0] sm:$0x3]  }
   0xd   :  { %v33_v5 = vld [vmem:[#allocation0] sm:$0x3]  }
   0xe   :  { %16 = vrot.lane.b32.xlu0 %v15_v3, %s131_s9  ;;  %v39_v6 = vld [vmem:[#allocation0] sm:$0x3]  }
   0xf   :  { %28 = vrot.lane.b32.xlu1 %v27_v4, %s132_s10  ;;  %v45_v7 = vld [vmem:[#allocation0] sm:$0x3]  }
  0x10   :  { %v51_v8 = vld [vmem:[#allocation0] sm:$0x3]  }
  0x11   :  { %v57_v9 = vld [vmem:[#allocation0] sm:$0x3]  }
  0x12   :  { %34 = vrot.lane.b32.xlu0 %v33_v5, %s133_s11  ;;  %v63_v10 = vld [vmem:[#allocation0] sm:$0x3]  }
  0x13   :  { %40 = vrot.lane.b32.xlu1 %v39_v6, %s134_s12  ;;  %v6_v11 = vld [vmem:[#allocation0] sm:$0x3]  }
  0x14   :  { %8 = vst.msk [vmem:[%s222_s1] ss:$16 sm:$0x3] %vm7_vm0, %v6_v11   ;;  %v69_v12 = vld [vmem:[#allocation0] sm:$0x3]  }
  0x15   :  { %v75_v13 = vld [vmem:[#allocation0] sm:$0x3]  }
  0x16   :  { %46 = vrot.lane.b32.xlu0 %v45_v7, %s135_s13  ;;  %v81_v14 = vld [vmem:[#allocation0] sm:$0x3]  }
  0x17   :  { %52 = vrot.lane.b32.xlu1 %v51_v8, %s136_s14  ;;  %v87_v15 = vld [vmem:[#allocation0] sm:$0x3]  }
  0x18   :  { %v93_v16 = vld [vmem:[#allocation0] sm:$0x3]  }
  0x1a   :  { %58 = vrot.lane.b32.xlu0 %v57_v9, %s137_s17 }
  0x1b   :  { %64 = vrot.lane.b32.xlu1 %v63_v10, %s138_s18 }
  0x1e   :  { %70 = vrot.lane.b32.xlu0 %v69_v12, %s139_s19 }
  0x1f   :  { %76 = vrot.lane.b32.xlu1 %v75_v13, %s140_s20 }
  0x22   :  { %82 = vrot.lane.b32.xlu0 %v81_v14, %s141_s21 }
  0x23   :  { %88 = vrot.lane.b32.xlu1 %v87_v15, %s142_s22 }
  0x26   :  { %94 = vrot.lane.b32.xlu0 %v93_v16, %s143_s23 }
  0x7c   :  { %v11_v17 = vpop.permute.xlu0 %10  }
  0x7d   :  { %v23_v18 = vpop.permute.xlu1 %22   ;;  %99 = vst.msk [vmem:[%s222_s1 + $0x1] ss:$16 sm:$0x3] %vm7_vm0, %v11_v17  }
  0x7e   :  { %101 = vst.msk [vmem:[%s222_s1 + $0x3] ss:$16 sm:$0x3] %vm7_vm0, %v23_v18  }
  0x80   :  { %v17_v19 = vpop.permute.xlu0 %16  }
  0x81   :  { %v29_v20 = vpop.permute.xlu1 %28   ;;  %100 = vst.msk [vmem:[%s222_s1 + $0x2] ss:$16 sm:$0x3] %vm7_vm0, %v17_v19  }
  0x82   :  { %102 = vst.msk [vmem:[%s222_s1 + $0x4] ss:$16 sm:$0x3] %vm7_vm0, %v29_v20  }
  0x84   :  { %v35_v21 = vpop.permute.xlu0 %34  }
  0x85   :  { %v41_v22 = vpop.permute.xlu1 %40   ;;  %103 = vst.msk [vmem:[%s222_s1 + $0x5] ss:$16 sm:$0x3] %vm7_vm0, %v35_v21  }
  0x86   :  { %104 = vst.msk [vmem:[%s222_s1 + $0x6] ss:$16 sm:$0x3] %vm7_vm0, %v41_v22  }
  0x88   :  { %v47_v23 = vpop.permute.xlu0 %46  }
  0x89   :  { %v53_v24 = vpop.permute.xlu1 %52   ;;  %105 = vst.msk [vmem:[%s222_s1 + $0x7] ss:$16 sm:$0x3] %vm7_vm0, %v47_v23  }
  0x8a   :  { %106 = vst.msk [vmem:[%s222_s1 + $0x8] ss:$16 sm:$0x3] %vm7_vm0, %v53_v24  }
  0x8c   :  { %v59_v25 = vpop.permute.xlu0 %58  }
  0x8d   :  { %v65_v26 = vpop.permute.xlu1 %64   ;;  %107 = vst.msk [vmem:[%s222_s1 + $0x9] ss:$16 sm:$0x3] %vm7_vm0, %v59_v25  }
  0x8e   :  { %108 = vst.msk [vmem:[%s222_s1 + $0xa] ss:$16 sm:$0x3] %vm7_vm0, %v65_v26  }
  0x90   :  { %v71_v27 = vpop.permute.xlu0 %70  }
  0x91   :  { %v77_v28 = vpop.permute.xlu1 %76   ;;  %109 = vst.msk [vmem:[%s222_s1 + $0xb] ss:$16 sm:$0x3] %vm7_vm0, %v71_v27  }
  0x92   :  { %110 = vst.msk [vmem:[%s222_s1 + $0xc] ss:$16 sm:$0x3] %vm7_vm0, %v77_v28  }
  0x94   :  { %v83_v29 = vpop.permute.xlu0 %82  }
  0x95   :  { %v89_v30 = vpop.permute.xlu1 %88   ;;  %111 = vst.msk [vmem:[%s222_s1 + $0xd] ss:$16 sm:$0x3] %vm7_vm0, %v83_v29  }
  0x96   :  { %112 = vst.msk [vmem:[%s222_s1 + $0xe] ss:$16 sm:$0x3] %vm7_vm0, %v89_v30  }
  0x98   :  { %v95_v31 = vpop.permute.xlu0 %94  }
  0x99   :  { %113 = vst.msk [vmem:[%s222_s1 + $0xf] ss:$16 sm:$0x3] %vm7_vm0, %v95_v31  }

// kernel: feature_extractor_forward.3
= control target key start
LH: loop header
LB: loop body
LE: loop exit
PB: predicated region body
PF: predicated region fallthrough
CT: control target
= control target key end

     0   :  { %v139_v2 = vmov 0   ;;  %s209_s0 = inlined_call_operand.vmem [shape: bf16[32,16], index: 0, kind: input, shape index: {}]   ;;  %s210_s1 = inlined_call_operand.vmem [shape: f32[32,1], index: 1, kind: input, shape index: {}]   ;;  %s211_s2 = inlined_call_operand.vmem [shape: f32[32,1], index: 2, kind: input, shape index: {}]   ;;  %s212_s3 = inlined_call_operand.hbm [shape: f32[32,16], index: 3, kind: output, shape index: {}]  }
   0x1   :  { %v25_v0 = vld [vmem:[%s210_s1 + $0x10] sm:$0xff]  ;;  %v23_v1 = vld [vmem:[%s210_s1] sm:$0xff]  ;;  %114 = vset.pattern.permute.xlu1 %v139_v2  ;;  %113 = vset.pattern.permute.xlu0 %v139_v2  ;;  %v26_v3 = vld [vmem:[%s210_s1 + $0x18] sm:$0xff] }
   0x2   :  { %39 = vperm.xlu1 %114, %v25_v0   ;;  %29 = vperm.xlu0 %113, %v23_v1   ;;  %v24_v4 = vld [vmem:[%s210_s1 + $0x8] sm:$0xff] }
   0x3   :  { %8 = vsyncpa [#allocation3], 0  ;;  %v52_v5 = vld [vmem:[%s211_s2 + $0x8] sm:$0xff]  ;;  %v51_v6 = vld [vmem:[%s211_s2] sm:$0xff]  ;;  %vm79_vm0 = vcmask 130048  }
   0x4   :  { %v54_v7 = vld [vmem:[%s211_s2 + $0x18] sm:$0xff]  ;;  %v53_v8 = vld [vmem:[%s211_s2 + $0x10] sm:$0xff]  ;;  %v101_v11 = vld [vmem:[%s209_s0] sm:$0xff]   ;;  %s140_s2 = smov [#allocation2]  }
   0x5   :  { %v102_v12 = vunpack.c.l.bf16 %v101_v11  ;;  %v103_v13 = vunpack.c.h.bf16 %v101_v11  ;;  %v108_v14 = vld [vmem:[%s209_s0 + $0x8] sm:$0xff]   ;;  %s89_s4 = sshll.u32 %s140_s2, 4  ;;  %s90_s4 = int_to_ptr.vmem [resolvable:$true] %s89_s4 }
   0x6   :  { %44 = vperm.xlu1 %114, %v26_v3   ;;  %34 = vperm.xlu0 %113, %v24_v4   ;;  %v106_v17 = vunpack.c.l.bf16 %v108_v14  ;;  %v107_v19 = vunpack.c.h.bf16 %v108_v14  ;;  %s115_s0 = scalar_lea.vmem %s90_s4, 512  ;;  %p120_p1 = scmp.lt.s32.totalorder %s90_s4, %s90_s4 }
   0x7   :  { %p116_p0 = scmp.ne.s32.totalorder %s90_s4, %s115_s0  ;;  %p121_p2 = scmp.lt.s32.totalorder %s115_s0, %s115_s0 }
   0x9   :  { %p122_p3 = por %p121_p2, %p120_p1 }
   0xa   :  { %62 = vperm.xlu1 %114, %v52_v5   ;;  %57 = vperm.xlu0 %113, %v51_v6  }
   0xb   :  { %p123_p4 = pnand %p122_p3, %p116_p0 }
   0xe   :  { %72 = vperm.xlu1 %114, %v54_v7   ;;  %67 = vperm.xlu0 %113, %v53_v8  }
  0x81   :  { %v40_v9 = vpop.permute.xlu1 %39  ;;  %v30_v10 = vpop.permute.xlu0 %29 }
  0x82   :  { %v47_v18 = vmul.f32 %v102_v12, %v30_v10  ;;  %v49_v25 = vmul.f32 %v106_v17, %v40_v9 }
  0x85   :  { %v45_v15 = vpop.permute.xlu1 %44  ;;  %v35_v16 = vpop.permute.xlu0 %34 }
  0x86   :  { %v48_v20 = vmul.f32 %v103_v13, %v35_v16  ;;  %v50_v26 = vmul.f32 %v107_v19, %v45_v15 }
  0x89   :  { %v63_v21 = vpop.permute.xlu1 %62  ;;  %v58_v22 = vpop.permute.xlu0 %57 }
  0x8a   :  { %v76_v23 = vadd.f32 %v63_v21, %v48_v20  ;;  %v75_v24 = vadd.f32 %v58_v22, %v47_v18 }
  0x8c   :  { %81 = vst.msk [vmem:[#allocation2 + $0x8] sm:$0xff] %vm79_vm0, %v76_v23  ;;  %80 = vst.msk [vmem:[#allocation2] sm:$0xff] %vm79_vm0, %v75_v24 }
  0x8d   :  { %v73_v27 = vpop.permute.xlu1 %72  ;;  %v68_v28 = vpop.permute.xlu0 %67 }
  0x8e   :  { %v78_v29 = vadd.f32 %v73_v27, %v50_v26  ;;  %v77_v30 = vadd.f32 %v68_v28, %v49_v25 }
  0x90   :  { %83 = vst.msk [vmem:[#allocation2 + $0x18] sm:$0xff] %vm79_vm0, %v78_v29  ;;  %82 = vst.msk [vmem:[#allocation2 + $0x10] sm:$0xff] %vm79_vm0, %v77_v30 }
  0x91   :  { %126 = shalt.err (!%p123_p4)
}
  0x92   :  { %s127_s7 = scalar_lea.hbm %s212_s3, 512 }
  0x93   :  { %p128_p5 = scmp.ne.s32.totalorder %s212_s3, %s127_s7  ;;  %p131_p6 = scmp.lt.u32.totalorder %s127_s7, %s212_s3 }
  0x95   :  { %p133_p7 = pnand %p131_p6, %p128_p5 }
  0x97   :  { %136 = shalt.err (!%p133_p7)
}
  0x98   :  { %s141_s12 = smov 128   ;;  %s142_s13 = smov 8  }
  0x99   :  { %95 = dma.vmem_to_hbm [thread:$0]  %s90_s4, 512, %s212_s3, [#allocation3], %s141_s12, %s141_s12, %s142_s13  }
  0x9a   :  { %137 = dma.done.wait [#allocation3], 512  }
  0x9b   :  { %138 = vsyncadd [#allocation3], 4294966784 }
  0x9c   :  { %99 = vsyncpa [#allocation3], 1 }

// kernel: feature_extractor_forward.2
= control target key start
LH: loop header
LB: loop body
LE: loop exit
PB: predicated region body
PF: predicated region fallthrough
CT: control target
= control target key end

     0   :  { %s1166_s24 = smov 0   ;;  %s1168_s25 = smov 0   ;;  %s1281_s0 = inlined_call_operand.vmem [shape: f32[2,16,64], index: 0, kind: input, shape index: {}]   ;;  %s1282_s1 = inlined_call_operand.vmem [shape: f32[2,1,2,64], index: 1, kind: input, shape index: {}]   ;;  %s1283_s2 = inlined_call_operand.vmem [shape: bf16[64,4], index: 2, kind: input, shape index: {}]   ;;  %s1284_s3 = inlined_call_operand.vmem [shape: f32[1,4], index: 3, kind: input, shape index: {}]   ;;  %s1285_s4 = inlined_call_operand.vmem [shape: bf16[3,16,4], index: 4, kind: input, shape index: {}]   ;;  %s1286_s5 = inlined_call_operand.vmem [shape: f32[16,1], index: 5, kind: input, shape index: {}]   ;;  %s1287_s6 = inlined_call_operand.vmem [shape: bf16[2,16,16], index: 6, kind: output, shape index: {0}]   ;;  %s1288_s7 = inlined_call_operand.vmem [shape: f32[2,1,16,2], index: 7, kind: output, shape index: {1}]  }
   0x1   :  { %s1170_s26 = smov 0  }
   0x2 LB: > { %s30_s27 = sadd.s32 1, %s1114_s25  ;;  %p965_p0 = scmp.ge.s32.totalorder %s1118_s26, 1  ;;  %s1118_s26 = sphi %s1170_s26, %s18_s26   ;;  %s1114_s25 = sphi %s1168_s25, %s1290_s25   ;;  %s1110_s24 = sphi %s1166_s24, %s1289_s24  }
   0x3   : > { %p32_p1 = scmp.ge.s32.totalorder %s30_s27, 2  ;;  %p277_p2 = scmp.lt.s32.totalorder %s1118_s26, 3 }
   0x5   : > { %s1292_s27 = smov (%p32_p1, %s30_s27), 0  ;;  %p278_p3 = pnand %p965_p0, %p277_p2 }
   0x6   : > { %v1089_v0 = vld [vmem:[%s1283_s2] sm:$0xff] (!%p278_p3)   ;;  %v1120_v1 = vmov (!%p278_p3), 0.0   ;;  %v1090_v2 = vld [vmem:[%s1283_s2 + $0x8] sm:$0xff] (!%p278_p3)   ;;  %vm1121_vm0 = vmmov (!%p278_p3), 0   ;;  %p333_p4 = scmp.lt.s32.totalorder (!%p278_p3), %s1110_s24, 1  ;;  %v1091_v3 = vld [vmem:[%s1283_s2 + $0x10] sm:$0xff] (!%p278_p3)  }
   0x7   : > { %281 = sbr.rel (%p278_p3) target bundleno = 865 (0x361), region = 44  ;;  %1015 = vmatprep.subr.bf16.mxu0 (!%p278_p3), %v1120_v1  ;;  %1027 = vmatprep.subr.bf16.mxu1 (!%p278_p3), %v1120_v1  ;;  %v1092_v4 = vld [vmem:[%s1283_s2 + $0x18] sm:$0xff] (!%p278_p3)   ;;  %vm409_vm1 = vcmask (!%p278_p3), 523264   ;;  %v973_v8 = vld [vmem:[%s1284_s3] ss:$0 sm:$0xff] (!%p278_p3)  ;;  %s1122_s23 = smov (!%p278_p3), 14  }
   0x8   : > { %1016 = vmatpush3.bf16.msra.mxu0 (!%p278_p3), %v1089_v0  ;;  %1023 = vmatprep.mubr.msk.bf16.mxu0 (!%p278_p3), %vm1121_vm0, %v1120_v1  ;;  %vm611_vm2 = vcmask (!%p278_p3), 1041408   ;;  %v1123_v22 = vmov (!%p278_p3), 0   ;;  %s1124_s28 = smov (!%p278_p3), 1   ;;  %v1093_v25 = vld [vmem:[%s1285_s4 + $0x8] sm:$0xff] (!%p278_p3)   ;;  %vm607_vm3 = vcmask (!%p278_p3), 31744   ;;  %s1125_s8 = smov (!%p278_p3), 127  }
   0x9   : > { %1017 = vmatprep.subr.bf16.mxu0 (!%p278_p3), %v1120_v1  ;;  %1028 = vmatpush3.bf16.msra.mxu1 (!%p278_p3), %v1089_v0  ;;  %v765_v26 = vld [vmem:[%s1286_s5] sm:$0xff] (!%p278_p3)  ;;  %v766_v27 = vld [vmem:[%s1286_s5 + $0x8] sm:$0xff] (!%p278_p3)  ;;  %vm583_vm4 = vcmask (!%p278_p3), 7168   ;;  %vm594_vm5 = vcmask (!%p278_p3), 121856   ;;  %v1095_v42 = vld [vmem:[%s1285_s4 + $0x10] sm:$0xff] (!%p278_p3)   ;;  %vm779_vm6 = vcmask (!%p278_p3), 130048  }
   0xa   : > { %1029 = vmatprep.subr.bf16.mxu1 (!%p278_p3), %v1120_v1  ;;  %1035 = vmatprep.mubr.msk.bf16.mxu1 (!%p278_p3), %vm1121_vm0, %v1120_v1  ;;  %v1094_v38 = vld [vmem:[%s1285_s4] sm:$0xff] (!%p278_p3)   ;;  %vm807_vm7 = vcmask (!%p278_p3), 125952   ;;  %vm796_vm8 = vcmask (!%p278_p3), 15360  }
   0xb   : > { %1087 = vset.pattern.permute.xlu1 (!%p278_p3), %v1123_v22 }
   0xc   : > { %1018 = vmatpush3.bf16.msra.mxu0 (!%p278_p3), %v1090_v2 }
   0xd   : > { %1019 = vmatprep.subr.bf16.mxu0 (!%p278_p3), %v1120_v1  ;;  %1030 = vmatpush3.bf16.msra.mxu1 (!%p278_p3), %v1090_v2 }
   0xe   : > { %s1294_s24 = smov (!%p333_p4, %s1110_s24), 1  ;;  %1031 = vmatprep.subr.bf16.mxu1 %v1120_v1 }
   0xf   : > { %s994_s11 = sshll.u32 %s1294_s24, 4  ;;  %s968_s19 = sshll.u32 %s1294_s24, 1 }
  0x10   : > { %s340_s14 = scalar_lea.vmem %s1281_s0, %s994_s11  ;;  %1020 = vmatpush3.bf16.msra.mxu0 %v1091_v3  ;;  %s348_s22 = scalar_lea.vmem %s1282_s1, %s968_s19 }
  0x11   : > { %v367_v5 = vld [vmem:[%s340_s14] sm:$0xff]  ;;  %v368_v6 = vld [vmem:[%s340_s14 + $0x8] sm:$0xff]  ;;  %1021 = vmatprep.subr.bf16.mxu0 %v1120_v1  ;;  %1032 = vmatpush3.bf16.msra.mxu1 %v1091_v3  ;;  %s995_s18 = sshll.u32 %s1294_s24, 3 }
  0x12   : > { %1033 = vmatprep.subr.bf16.mxu1 %v1120_v1  ;;  %v369_v7 = vpack.c.bf16 %v368_v6, %v367_v5  ;;  %v490_v19 = vld [vmem:[%s348_s22] sm:$0x3]  ;;  %s356_s21 = scalar_lea.vmem %s1287_s6, %s995_s18 }
  0x13   : > { %v491_v20 = vpack.c.bf16 %v490_v19, %v490_v19 }
  0x14   : > { %1022 = vmatpush3.bf16.msra.mxu0 %v1092_v4 }
  0x15   : > { %1039 = vmatprep.subr.bf16.mxu0 %v1120_v1  ;;  %1034 = vmatpush3.bf16.msra.mxu1 %v1092_v4 }
  0x16   : > { %1045 = vmatprep.subr.bf16.mxu1 %v1120_v1 }
  0x17   : > { %1024 = vmatmul.mubr.msk.bf16.vlgmr.msra.gmra.mrb[0].mxu0 %vm409_vm1, %v369_v7 }
  0x18   : > { %1041 = vmatprep.mubr.msk.bf16.mxu0 %vm1121_vm0, %v1120_v1  ;;  %1036 = vmatmul.mubr.msk.bf16.vlgmr.msra.gmra.mrb[0].mxu1 %vm409_vm1, %v491_v20 }
  0x19   : > { %1047 = vmatprep.mubr.msk.bf16.mxu1 %vm1121_vm0, %v1120_v1 }
  0xea   : > { %v447_v9 = vpop.f32.mrb[0].mxu0 }
  0xeb   : > { %v448_v10 = vadd.f32 %v973_v8, %v447_v9  ;;  %v1025_v11 = vpop.f32.mrb[1].mxu0  ;;  %v529_v28 = vpop.f32.mrb[0].mxu1 }
  0xec   : > { %v450_v12 = vpop.f32.mrb[2].mxu0  ;;  %v1037_v29 = vpop.f32.mrb[1].mxu1 }
  0xed   : > { %v451_v13 = vadd.f32 %v973_v8, %v450_v12  ;;  %v1026_v14 = vpop.f32.mrb[3].mxu0  ;;  %v454_v15 = vmul.f32 0.2, %v448_v10  ;;  %v532_v30 = vpop.f32.mrb[2].mxu1 }
  0xee   : > { %v1038_v31 = vpop.f32.mrb[3].mxu1 }
  0xef   : > { %v455_v16 = vmul.f32 0.2, %v451_v13  ;;  %v456_v17 = vmax.f32 %v448_v10, %v454_v15 }
  0xf1   : > { %458 = vxpose.xlu0.b32.start [1/2] (short) (narrow) %v456_v17, 8  ;;  %v457_v18 = vmax.f32 %v451_v13, %v455_v16 }
  0xf5   : > { %459 = vxpose.xlu0.b32.end [2/2] (short) (narrow) %v457_v18, 8 }
 0x11e   : > { %591 = vrot.lane.b32.xlu0 %v1120_v1, %s1122_s23 }
 0x11f   : > { %1088 = vset.pattern.permute.xlu0 %v1123_v22 }
 0x171   : > { %v474_v21 = vpop.trf.xlu0 }
 0x172   : > { %v586_v23 = vpack.c.bf16 %v474_v21, %v474_v21  ;;  %580 = vrot.lane.b32.xlu1 %v474_v21, %s1124_s28  ;;  %s365_s28 = scalar_lea.vmem %s1288_s7, %s994_s11 }
 0x174   : > { %v613_v24 = vsel %vm611_vm2, %v586_v23, 0 }
 0x175   : > { %1040 = vmatpush3.bf16.msra.mxu0 %v613_v24 }
 0x176   : > { %587 = vrot.lane.b32.xlu1 %v474_v21, %s1125_s8  ;;  %1051 = vmatprep.subr.bf16.mxu0 %v1120_v1 }
 0x178   : > { %1042 = vmatmul.mubr.msk.bf16.vlgmr.msra.gmra.mrb[4].mxu0 %vm607_vm3, %v1093_v25 }
 0x179   : > { %1053 = vmatprep.mubr.msk.bf16.mxu0 %vm1121_vm0, %v1120_v1 }
 0x17a   : > { %769 = vperm.xlu1 %1087, %v765_v26  }
 0x17e   : > { %774 = vperm.xlu1 %1087, %v766_v27  }
 0x190   : > { %v592_v35 = vpop.permute.xlu0 %591 }
 0x1e4   : > { %v581_v32 = vpop.permute.xlu1 %580 }
 0x1e5   : > { %v584_v33 = vsel %vm583_vm4, 0.0, %v581_v32 }
 0x1e6   : > { %v585_v34 = vpack.c.bf16 %v584_v33, %v584_v33 }
 0x1e8   : > { %v665_v36 = vsel %vm611_vm2, %v585_v34, 0  ;;  %v588_v37 = vpop.permute.xlu1 %587 }
 0x1e9   : > { %v595_v39 = vsel %vm594_vm5, %v588_v37, %v592_v35  ;;  %1046 = vmatpush3.bf16.msra.mxu1 %v665_v36 }
 0x1ea   : > { %v596_v40 = vpack.c.bf16 %v595_v39, %v595_v39 }
 0x1ec   : > { %1048 = vmatmul.mubr.msk.bf16.vlgmr.msra.gmra.mrb[4].mxu1 %vm607_vm3, %v1094_v38  ;;  %v720_v41 = vsel %vm611_vm2, %v596_v40, 0 }
 0x1ed   : > { %1052 = vmatpush3.bf16.msra.mxu0 %v720_v41 }
 0x1f0   : > { %1054 = vmatmul.mubr.msk.bf16.vlgmr.msra.gmra.mrb[8].mxu0 %vm607_vm3, %v1095_v42 }
 0x1f9   : > { %v770_v51 = vpop.permute.xlu1 %769 }
 0x1fd   : > { %v775_v61 = vpop.permute.xlu1 %774 }
 0x24b   : > { %v649_v43 = vpop.f32.mrb[4].mxu0 }
 0x24c   : > { %v1043_v44 = vpop.f32.mrb[5].mxu0 }
 0x24d   : > { %v652_v45 = vpop.f32.mrb[6].mxu0 }
 0x24e   : > { %v1044_v46 = vpop.f32.mrb[7].mxu0 }
 0x2bf   : > { %v701_v47 = vpop.f32.mrb[4].mxu1 }
 0x2c0   : > { %v702_v48 = vadd.f32 %v701_v47, %v649_v43  ;;  %v1049_v49 = vpop.f32.mrb[5].mxu1 }
 0x2c1   : > { %v704_v50 = vpop.f32.mrb[6].mxu1 }
 0x2c2   : > { %v705_v52 = vadd.f32 %v704_v50, %v652_v45  ;;  %v1050_v53 = vpop.f32.mrb[7].mxu1 }
 0x2c3   : > { %v756_v54 = vpop.f32.mrb[8].mxu0 }
 0x2c4   : > { %v763_v55 = vadd.f32 %v756_v54, %v702_v48  ;;  %v1055_v56 = vpop.f32.mrb[9].mxu0 }
 0x2c5   : > { %v759_v57 = vpop.f32.mrb[10].mxu0 }
 0x2c6   : > { %v777_v58 = vadd.f32 %v770_v51, %v763_v55  ;;  %v764_v59 = vadd.f32 %v759_v57, %v705_v52  ;;  %v1056_v60 = vpop.f32.mrb[11].mxu0 }
 0x2c8   : > { %v997_v62 = vpack.c.bf16 %v777_v58, %v777_v58  ;;  %v778_v63 = vadd.f32 %v775_v61, %v764_v59  ;;  %v780_v0 = vsel %vm779_vm6, %v777_v58, 0.0  ;;  %v786_v1 = vmul.f32 %v777_v58, %v777_v58 }
 0x2c9   : > { %781 = vadd.xlane.f32.xlu1 %v780_v0 }
 0x2ca   : > { %808 = vst.msk [vmem:[%s356_s21] sm:$0xf] %vm807_vm7, %v997_v62  ;;  %v998_v2 = vpack.c.bf16 %v778_v63, %v778_v63  ;;  %v783_v3 = vsel %vm779_vm6, %v778_v63, 0.0  ;;  %v788_v4 = vsel %vm779_vm6, %v786_v1, 0.0  ;;  %v787_v5 = vmul.f32 %v778_v63, %v778_v63 }
 0x2cb   : > { %784 = vadd.xlane.f32.xlu0 %v783_v3 }
 0x2cc   : > { %809 = vst.msk [vmem:[%s356_s21 + $0x4] sm:$0xf] %vm807_vm7, %v998_v2  ;;  %v791_v6 = vsel %vm779_vm6, %v787_v5, 0.0 }
 0x2cd   : > { %789 = vadd.xlane.f32.xlu1 %v788_v4 }
 0x2d1   : > { %792 = vadd.xlane.f32.xlu1 %v791_v6 }
 0x356   : > { %v782_v7 = vpop.xlane.xlu1 %781 }
 0x358   : > { %v785_v10 = vpop.xlane.xlu0 %784 }
 0x35a   : > { %v790_v8 = vpop.xlane.xlu1 %789 }
 0x35b   : > { %v794_v9 = vsel %vm583_vm4, %v782_v7, %v790_v8 }
 0x35c   : > { %797 = vst.msk [vmem:[%s365_s28] sm:$0xff] %vm796_vm8, %v794_v9 }
 0x35e   : > { %v793_v11 = vpop.xlane.xlu1 %792 }
 0x35f   : > { %v795_v12 = vsel %vm583_vm4, %v785_v10, %v793_v11 }
 0x360   : > { %798 = vst.msk [vmem:[%s365_s28 + $0x8] sm:$0xff] %vm796_vm8, %v795_v12 }
 0x361 PF: > { %s18_s26 = sadd.s32 1, %s1118_s26   ;;  %s1289_s24 = smov %s1114_s25 }
 0x362   : > { %p15_p5 = scmp.ge.s32.totalorder %s18_s26, 4   ;;  %s1290_s25 = smov %s1292_s27 }
 0x364   :  { %17 = sbr.rel (!%p15_p5) target bundleno = 2 (0x2), region = 91 }

</bundles_post_ra>
